<compile_context>
chip_gen: v7x
topology: tpu7x:2x2x1
jax: 0.10.0
libtpu: 0.0.40
codegen_flags: <defaults>
</compile_context>

<pallas_src>
import functools

import jax
import jax.numpy as jnp
from jax.experimental import pallas as pl
from jax.experimental.pallas import tpu as pltpu


# ---------------------------------------------------------------------------
# Config (small, consistent with the module)
# ---------------------------------------------------------------------------
SRC_VOCAB_SIZE = 64
PRETRAINED_EMBED_DIM = 128
EMBEDDING_DIM = 128
TGT_VOCAB_SIZE = 128          # lane-dense output (multiple of 128)
HIDDEN_PAD = 128              # E//2=64 and E//4=32 are zero-padded to 128 lanes
TM_MAX = 1024                 # row tile upper bound; sweep 256-2048


# ---------------------------------------------------------------------------
# Stage 1: compute the per-source-token log-prob LUT (runs once, 64 rows)
#   LUT[v] = log_softmax(MLP(Linear(emb_table[v])))
# ---------------------------------------------------------------------------
def build_lut_kernel(emb_ref,
                     w0_ref, b0_ref,
                     w1_ref, b1_ref,
                     w2_ref, b2_ref,
                     w3_ref, b3_ref,
                     lut_ref):
    x = emb_ref[...]                                                    # (64, D_PRE)
    # src_embedding_transform_layer: Linear(PRETRAINED_EMBED_DIM -> EMBEDDING_DIM)
    h0 = jnp.dot(x, w0_ref[...], preferred_element_type=jnp.float32) + b0_ref[...]
    # MLP layer 1 (Dropout=identity in eval), ReLU
    h1 = jnp.maximum(
        jnp.dot(h0, w1_ref[...], preferred_element_type=jnp.float32) + b1_ref[...], 0.0)
    # MLP layer 2, ReLU
    h2 = jnp.maximum(
        jnp.dot(h1, w2_ref[...], preferred_element_type=jnp.float32) + b2_ref[...], 0.0)
    # MLP layer 3 -> logits
    logits = jnp.dot(h2, w3_ref[...], preferred_element_type=jnp.float32) + b3_ref[...]
    # log_softmax over vocab axis — f32 throughout (v5e-safe)
    m = jnp.max(logits, axis=-1, keepdims=True)
    shifted = logits - m
    lse = jnp.log(jnp.sum(jnp.exp(shifted), axis=-1, keepdims=True))
    lut_ref[...] = (shifted - lse).astype(lut_ref.dtype)


# ---------------------------------------------------------------------------
# Stage 2: per-token one-hot gather of LUT rows (single MXU pass per tile,
# no transcendentals — HBM-store-bound)
# ---------------------------------------------------------------------------
def gather_kernel(ids_ref, lut_ref, out_ref):
    tm = ids_ref.shape[0]
    vsrc = lut_ref.shape[0]
    ids = ids_ref[...]                                              # (tm, 1) int32
    iota = jax.lax.broadcasted_iota(jnp.int32, (tm, vsrc), 1)       # (tm, 64)
    onehot = (iota == ids).astype(jnp.float32)                      # exact 0/1
    out_ref[...] = jnp.dot(onehot, lut_ref[...],
                           preferred_element_type=jnp.float32).astype(out_ref.dtype)


# ---------------------------------------------------------------------------
# Wrappers
# ---------------------------------------------------------------------------
def _resident(a):
    """Full-array, grid-invariant block -> Pallas keeps it resident in VMEM."""
    return pl.BlockSpec(a.shape, lambda i: (0,) * a.ndim)


def build_lut(emb_table, padded_params):
    w0, b0, w1, b1, w2, b2, w3, b3 = padded_params
    V = w3.shape[1]
    args = (emb_table, w0, b0, w1, b1, w2, b2, w3, b3)
    return pl.pallas_call(
        build_lut_kernel,
        out_shape=jax.ShapeDtypeStruct((SRC_VOCAB_SIZE, V), jnp.float32),
        grid_spec=pl.GridSpec(
            grid=(1,),
            in_specs=[_resident(a) for a in args],
            out_specs=pl.BlockSpec((SRC_VOCAB_SIZE, V), lambda i: (0, 0)),
        ),
        compiler_params=pltpu.CompilerParams(
            dimension_semantics=("arbitrary",),
            vmem_limit_bytes=8 * 1024 * 1024),
    )(*args)


def gather_forward(ids, lut, tm):
    """ids: (M, 1) int32 with M % tm == 0. Returns (M, TGT_VOCAB_SIZE) f32."""
    M = ids.shape[0]
    V = lut.shape[1]
    cost = pl.CostEstimate(
        flops=2 * M * SRC_VOCAB_SIZE * V,
        transcendentals=0,
        bytes_accessed=4 * M + 4 * M * V + 4 * SRC_VOCAB_SIZE * V,
    )
    return pl.pallas_call(
        gather_kernel,
        out_shape=jax.ShapeDtypeStruct((M, V), jnp.float32),
        grid_spec=pl.GridSpec(
            grid=(M // tm,),
            in_specs=[
                pl.BlockSpec((tm, 1), lambda i: (i, 0)),   # token-id row tile
                _resident(lut),                            # 64x128 LUT stays in VMEM
            ],
            out_specs=pl.BlockSpec((tm, V), lambda i: (i, 0)),
        ),
        compiler_params=pltpu.CompilerParams(
            dimension_semantics=("parallel",),             # shards across v7x TCs
            vmem_limit_bytes=24 * 1024 * 1024),
        cost_estimate=cost,
    )(ids, lut)


def _choose_tm(m):
    """Large row tile, but prefer >=2 grid steps so v7x's 2 TCs both work."""
    tm = TM_MAX
    while tm > 256 and m <= tm:
        tm //= 2
    return max(tm, 256)       # multiples of 256 (v6e/v7x MXU), 128 (v5e)


# ---------------------------------------------------------------------------
# Parameter init (deterministic, synthetic) + full module forward
# ---------------------------------------------------------------------------
def init_params(key):
    keys = jax.random.split(key, 9)
    scale = 0.02
    emb_table = scale * jax.random.normal(
        keys[0], (SRC_VOCAB_SIZE, PRETRAINED_EMBED_DIM), jnp.float32)

    def linear(kw, kb, din, dout):
        w = scale * jax.random.normal(kw, (din, dout), jnp.float32)
        b = scale * jax.random.normal(kb, (1, dout), jnp.float32)
        return w, b

    e = EMBEDDING_DIM
    w0, b0 = linear(keys[1], keys[2], PRETRAINED_EMBED_DIM, e)
    w1, b1 = linear(keys[3], keys[4], e, e // 2)
    w2, b2 = linear(keys[5], keys[6], e // 2, e // 4)
    w3, b3 = linear(keys[7], keys[8], e // 4, TGT_VOCAB_SIZE)
    return emb_table, (w0, b0, w1, b1, w2, b2, w3, b3)


def _pad_params_lane_dense(params):
    """Zero-pad the 64/32-wide hidden layers to 128 lanes (numerically identical)."""
    w0, b0, w1, b1, w2, b2, w3, b3 = params
    H = HIDDEN_PAD
    w1p = jnp.pad(w1, ((0, 0), (0, H - w1.shape[1])))
    b1p = jnp.pad(b1, ((0, 0), (0, H - b1.shape[1])))
    w2p = jnp.pad(w2, ((0, H - w2.shape[0]), (0, H - w2.shape[1])))
    b2p = jnp.pad(b2, ((0, 0), (0, H - b2.shape[1])))
    w3p = jnp.pad(w3, ((0, H - w3.shape[0]), (0, 0)))
    return w0, b0, w1p, b1p, w2p, b2p, w3p, b3


@functools.partial(jax.jit, static_argnames=("training",))
def seq2seq_bilstm_lite_forward(xs, x_lens, ys, emb_table, params,
                                training=False):
    """xs: (B, S) int32 token ids; x_lens: (B,) int32; ys: (B, T) int32."""
    del x_lens  # unused by the reference forward
    B, S = xs.shape
    _ = ys.shape[1] - 1  # max_ys_seq_len computed but unused in reference

    # Stage 1: fold the whole per-token network into a 64 x TGT_VOCAB LUT.
    padded_params = _pad_params_lane_dense(params)
    lut = build_lut(emb_table, padded_params)

    # Stage 2: per-token gather of log-prob rows.
    ids = xs.reshape(B * S, 1).astype(jnp.int32)
    M = B * S
    tm = _choose_tm(M)
    M_pad = pl.cdiv(M, tm) * tm
    if M_pad != M:
        ids = jnp.pad(ids, ((0, M_pad - M), (0, 0)))

    logp = gather_forward(ids, lut, tm)[:M]
    logp = logp.reshape(B, S, TGT_VOCAB_SIZE)

    if training:
        return logp
    return logp, None


# ---------------------------------------------------------------------------
# Pure-JAX reference (for correctness check)
# ---------------------------------------------------------------------------
def reference_forward(xs, emb_table, params):
    w0, b0, w1, b1, w2, b2, w3, b3 = params
    x = emb_table[xs]                                  # (B, S, D_PRE)
    h0 = x @ w0 + b0
    h1 = jnp.maximum(h0 @ w1 + b1, 0.0)
    h2 = jnp.maximum(h1 @ w2 + b2, 0.0)
    logits = h2 @ w3 + b3
    return jax.nn.log_softmax(logits, axis=-1)


# ---------------------------------------------------------------------------
if __name__ == "__main__":
    key = jax.random.PRNGKey(0)
    k_tok, k_ys, k_par = jax.random.split(key, 3)

    B, S, T = 2, 8, 5
    xs = jax.random.randint(k_tok, (B, S), 0, SRC_VOCAB_SIZE, jnp.int32)
    x_lens = jnp.full((B,), S, jnp.int32)
    ys = jax.random.randint(k_ys, (B, T), 0, TGT_VOCAB_SIZE, jnp.int32)

    emb_table, params = init_params(k_par)

    out, aux = seq2seq_bilstm_lite_forward(xs, x_lens, ys, emb_table, params,
                                           training=False)
    out = jax.block_until_ready(out)
    assert aux is None
    assert out.shape == (B, S, TGT_VOCAB_SIZE)

    # correctness: match the pure-JAX reference forward
    ref = reference_forward(xs, emb_table, params)
    assert jnp.max(jnp.abs(out - ref)) < 1e-4

    # sanity: log_softmax rows must (log-)sum to ~0
    row_lse = jax.scipy.special.logsumexp(out, axis=-1)
    assert jnp.max(jnp.abs(row_lse)) < 1e-4

    print("KERNEL_OK")
</pallas_src>

<mosaic_0001>
module attributes {stable_mosaic.version = 11 : i64} {
  func.func @gather_kernel(%arg0: i32, %arg1: memref<256x1xi32, #tpu.memory_space<vmem>>, %arg2: memref<64x128xf32, #tpu.memory_space<vmem>>, %arg3: memref<256x128xf32, #tpu.memory_space<vmem>>) attributes {dimension_semantics = [#tpu.dimension_semantics<parallel>], iteration_bounds = array<i64: 1>, scalar_prefetch = 0 : i64, scratch_operands = 0 : i64, tpu.core_type = #tpu.core_type<tc>, window_params = [{transform_indices = @transform_0, window_bounds = array<i64: 256, 1>}, {pipeline_mode = #tpu.pipeline_mode<synchronous>, transform_indices = @transform_1, window_bounds = array<i64: 64, 128>}, {transform_indices = @transform_2, window_bounds = array<i64: 256, 128>}]} {
    %c0 = arith.constant 0 : index
    %c0_0 = arith.constant 0 : index
    %0 = vector.load %arg1[%c0, %c0_0] : memref<256x1xi32, #tpu.memory_space<vmem>>, vector<256x1xi32>
    %1 = tpu.iota {dimensions = array<i32: 1>} : vector<256x64xi32>
    %2 = vector.broadcast %0 : vector<256x1xi32> to vector<256x64xi32>
    %3 = arith.cmpi eq, %1, %2 : vector<256x64xi32>
    %4 = arith.extui %3 : vector<256x64xi1> to vector<256x64xi32>
    %5 = arith.sitofp %4 : vector<256x64xi32> to vector<256x64xf32>
    %c0_1 = arith.constant 0 : index
    %c0_2 = arith.constant 0 : index
    %6 = vector.load %arg2[%c0_1, %c0_2] : memref<64x128xf32, #tpu.memory_space<vmem>>, vector<64x128xf32>
    %cst = arith.constant dense<0.000000e+00> : vector<256x128xf32>
    %7 = tpu.matmul %5, %6, %cst {dimension_numbers = #tpu.dot_dimension_numbers<[1], [0], [0], [1], [0, 0, 1, 1], [], []>} : vector<256x64xf32>, vector<64x128xf32>, vector<256x128xf32> -> vector<256x128xf32>
    %c0_3 = arith.constant 0 : index
    %c0_4 = arith.constant 0 : index
    %8 = vector.load %arg3[%c0_3, %c0_4] : memref<256x128xf32, #tpu.memory_space<vmem>>, vector<256x128xf32>
    tpu.vector_store %arg3[%c0_3, %c0_4], %7 {strides = array<i32>} : memref<256x128xf32, #tpu.memory_space<vmem>>, vector<256x128xf32>,
    return
  }
  func.func @transform_0(%arg0: i32) -> (i32, i32) {
    %c0_i32 = arith.constant 0 : i32
    %c0_i32_0 = arith.constant 0 : i32
    return %arg0, %c0_i32 : i32, i32
  }
  func.func @transform_1(%arg0: i32) -> (i32, i32) {
    %c0_i32 = arith.constant 0 : i32
    %c0_i32_0 = arith.constant 0 : i32
    %c0_i32_1 = arith.constant 0 : i32
    return %c0_i32, %c0_i32_0 : i32, i32
  }
  func.func @transform_2(%arg0: i32) -> (i32, i32) {
    %c0_i32 = arith.constant 0 : i32
    %c0_i32_0 = arith.constant 0 : i32
    return %arg0, %c0_i32 : i32, i32
  }
}

module attributes {stable_mosaic.version = 11 : i64} {
  func.func @build_lut_kernel(%arg0: i32, %arg1: memref<64x128xf32, #tpu.memory_space<vmem>>, %arg2: memref<128x128xf32, #tpu.memory_space<vmem>>, %arg3: memref<1x128xf32, #tpu.memory_space<vmem>>, %arg4: memref<128x128xf32, #tpu.memory_space<vmem>>, %arg5: memref<1x128xf32, #tpu.memory_space<vmem>>, %arg6: memref<128x128xf32, #tpu.memory_space<vmem>>, %arg7: memref<1x128xf32, #tpu.memory_space<vmem>>, %arg8: memref<128x128xf32, #tpu.memory_space<vmem>>, %arg9: memref<1x128xf32, #tpu.memory_space<vmem>>, %arg10: memref<64x128xf32, #tpu.memory_space<vmem>>) attributes {dimension_semantics = [#tpu.dimension_semantics<arbitrary>], iteration_bounds = array<i64: 1>, scalar_prefetch = 0 : i64, scratch_operands = 0 : i64, tpu.core_type = #tpu.core_type<tc>, window_params = [{pipeline_mode = #tpu.pipeline_mode<synchronous>, transform_indices = @transform_0, window_bounds = array<i64: 64, 128>}, {pipeline_mode = #tpu.pipeline_mode<synchronous>, transform_indices = @transform_1, window_bounds = array<i64: 128, 128>}, {pipeline_mode = #tpu.pipeline_mode<synchronous>, transform_indices = @transform_2, window_bounds = array<i64: 1, 128>}, {pipeline_mode = #tpu.pipeline_mode<synchronous>, transform_indices = @transform_3, window_bounds = array<i64: 128, 128>}, {pipeline_mode = #tpu.pipeline_mode<synchronous>, transform_indices = @transform_4, window_bounds = array<i64: 1, 128>}, {pipeline_mode = #tpu.pipeline_mode<synchronous>, transform_indices = @transform_5, window_bounds = array<i64: 128, 128>}, {pipeline_mode = #tpu.pipeline_mode<synchronous>, transform_indices = @transform_6, window_bounds = array<i64: 1, 128>}, {pipeline_mode = #tpu.pipeline_mode<synchronous>, transform_indices = @transform_7, window_bounds = array<i64: 128, 128>}, {pipeline_mode = #tpu.pipeline_mode<synchronous>, transform_indices = @transform_8, window_bounds = array<i64: 1, 128>}, {pipeline_mode = #tpu.pipeline_mode<synchronous>, transform_indices = @transform_9, window_bounds = array<i64: 64, 128>}]} {
    %c0 = arith.constant 0 : index
    %c0_0 = arith.constant 0 : index
    %0 = vector.load %arg1[%c0, %c0_0] : memref<64x128xf32, #tpu.memory_space<vmem>>, vector<64x128xf32>
    %c0_1 = arith.constant 0 : index
    %c0_2 = arith.constant 0 : index
    %1 = vector.load %arg2[%c0_1, %c0_2] : memref<128x128xf32, #tpu.memory_space<vmem>>, vector<128x128xf32>
    %cst = arith.constant dense<0.000000e+00> : vector<64x128xf32>
    %2 = tpu.matmul %0, %1, %cst {dimension_numbers = #tpu.dot_dimension_numbers<[1], [0], [0], [1], [0, 0, 1, 1], [], []>} : vector<64x128xf32>, vector<128x128xf32>, vector<64x128xf32> -> vector<64x128xf32>
    %c0_3 = arith.constant 0 : index
    %c0_4 = arith.constant 0 : index
    %3 = vector.load %arg3[%c0_3, %c0_4] : memref<1x128xf32, #tpu.memory_space<vmem>>, vector<1x128xf32>
    %4 = vector.broadcast %3 : vector<1x128xf32> to vector<64x128xf32>
    %5 = arith.addf %2, %4 : vector<64x128xf32>
    %c0_5 = arith.constant 0 : index
    %c0_6 = arith.constant 0 : index
    %6 = vector.load %arg4[%c0_5, %c0_6] : memref<128x128xf32, #tpu.memory_space<vmem>>, vector<128x128xf32>
    %cst_7 = arith.constant dense<0.000000e+00> : vector<64x128xf32>
    %7 = tpu.matmul %5, %6, %cst_7 {dimension_numbers = #tpu.dot_dimension_numbers<[1], [0], [0], [1], [0, 0, 1, 1], [], []>} : vector<64x128xf32>, vector<128x128xf32>, vector<64x128xf32> -> vector<64x128xf32>
    %c0_8 = arith.constant 0 : index
    %c0_9 = arith.constant 0 : index
    %8 = vector.load %arg5[%c0_8, %c0_9] : memref<1x128xf32, #tpu.memory_space<vmem>>, vector<1x128xf32>
    %9 = vector.broadcast %8 : vector<1x128xf32> to vector<64x128xf32>
    %10 = arith.addf %7, %9 : vector<64x128xf32>
    %cst_10 = arith.constant 0.000000e+00 : f32
    %11 = vector.broadcast %cst_10 : f32 to vector<64x128xf32>
    %12 = arith.maximumf %10, %11 : vector<64x128xf32>
    %c0_11 = arith.constant 0 : index
    %c0_12 = arith.constant 0 : index
    %13 = vector.load %arg6[%c0_11, %c0_12] : memref<128x128xf32, #tpu.memory_space<vmem>>, vector<128x128xf32>
    %cst_13 = arith.constant dense<0.000000e+00> : vector<64x128xf32>
    %14 = tpu.matmul %12, %13, %cst_13 {dimension_numbers = #tpu.dot_dimension_numbers<[1], [0], [0], [1], [0, 0, 1, 1], [], []>} : vector<64x128xf32>, vector<128x128xf32>, vector<64x128xf32> -> vector<64x128xf32>
    %c0_14 = arith.constant 0 : index
    %c0_15 = arith.constant 0 : index
    %15 = vector.load %arg7[%c0_14, %c0_15] : memref<1x128xf32, #tpu.memory_space<vmem>>, vector<1x128xf32>
    %16 = vector.broadcast %15 : vector<1x128xf32> to vector<64x128xf32>
    %17 = arith.addf %14, %16 : vector<64x128xf32>
    %cst_16 = arith.constant 0.000000e+00 : f32
    %18 = vector.broadcast %cst_16 : f32 to vector<64x128xf32>
    %19 = arith.maximumf %17, %18 : vector<64x128xf32>
    %c0_17 = arith.constant 0 : index
    %c0_18 = arith.constant 0 : index
    %20 = vector.load %arg8[%c0_17, %c0_18] : memref<128x128xf32, #tpu.memory_space<vmem>>, vector<128x128xf32>
    %cst_19 = arith.constant dense<0.000000e+00> : vector<64x128xf32>
    %21 = tpu.matmul %19, %20, %cst_19 {dimension_numbers = #tpu.dot_dimension_numbers<[1], [0], [0], [1], [0, 0, 1, 1], [], []>} : vector<64x128xf32>, vector<128x128xf32>, vector<64x128xf32> -> vector<64x128xf32>
    %c0_20 = arith.constant 0 : index
    %c0_21 = arith.constant 0 : index
    %22 = vector.load %arg9[%c0_20, %c0_21] : memref<1x128xf32, #tpu.memory_space<vmem>>, vector<1x128xf32>
    %23 = vector.broadcast %22 : vector<1x128xf32> to vector<64x128xf32>
    %24 = arith.addf %21, %23 : vector<64x128xf32>
    %cst_22 = arith.constant dense<0xFF800000> : vector<64xf32>
    %25 = vector.multi_reduction <maximumf>, %24, %cst_22 [1] : vector<64x128xf32> to vector<64xf32>
    %26 = vector.shape_cast %25 : vector<64xf32> to vector<64x1xf32>
    %27 = vector.broadcast %26 : vector<64x1xf32> to vector<64x128xf32>
    %28 = arith.subf %24, %27 : vector<64x128xf32>
    %29 = math.exp %28 : vector<64x128xf32>
    %cst_23 = arith.constant dense<0.000000e+00> : vector<64xf32>
    %30 = vector.multi_reduction <add>, %29, %cst_23 [1] : vector<64x128xf32> to vector<64xf32>
    %31 = vector.shape_cast %30 : vector<64xf32> to vector<64x1xf32>
    %32 = math.log %31 : vector<64x1xf32>
    %33 = vector.broadcast %32 : vector<64x1xf32> to vector<64x128xf32>
    %34 = arith.subf %28, %33 : vector<64x128xf32>
    %c0_24 = arith.constant 0 : index
    %c0_25 = arith.constant 0 : index
    %35 = vector.load %arg10[%c0_24, %c0_25] : memref<64x128xf32, #tpu.memory_space<vmem>>, vector<64x128xf32>
    tpu.vector_store %arg10[%c0_24, %c0_25], %34 {strides = array<i32>} : memref<64x128xf32, #tpu.memory_space<vmem>>, vector<64x128xf32>,
    return
  }
  func.func @transform_0(%arg0: i32) -> (i32, i32) {
    %c0_i32 = arith.constant 0 : i32
    %c0_i32_0 = arith.constant 0 : i32
    %c0_i32_1 = arith.constant 0 : i32
    return %c0_i32, %c0_i32_0 : i32, i32
  }
  func.func @transform_1(%arg0: i32) -> (i32, i32) {
    %c0_i32 = arith.constant 0 : i32
    %c0_i32_0 = arith.constant 0 : i32
    %c0_i32_1 = arith.constant 0 : i32
    return %c0_i32, %c0_i32_0 : i32, i32
  }
  func.func @transform_2(%arg0: i32) -> (i32, i32) {
    %c0_i32 = arith.constant 0 : i32
    %c0_i32_0 = arith.constant 0 : i32
    %c0_i32_1 = arith.constant 0 : i32
    return %c0_i32, %c0_i32_0 : i32, i32
  }
  func.func @transform_3(%arg0: i32) -> (i32, i32) {
    %c0_i32 = arith.constant 0 : i32
    %c0_i32_0 = arith.constant 0 : i32
    %c0_i32_1 = arith.constant 0 : i32
    return %c0_i32, %c0_i32_0 : i32, i32
  }
  func.func @transform_4(%arg0: i32) -> (i32, i32) {
    %c0_i32 = arith.constant 0 : i32
    %c0_i32_0 = arith.constant 0 : i32
    %c0_i32_1 = arith.constant 0 : i32
    return %c0_i32, %c0_i32_0 : i32, i32
  }
  func.func @transform_5(%arg0: i32) -> (i32, i32) {
    %c0_i32 = arith.constant 0 : i32
    %c0_i32_0 = arith.constant 0 : i32
    %c0_i32_1 = arith.constant 0 : i32
    return %c0_i32, %c0_i32_0 : i32, i32
  }
  func.func @transform_6(%arg0: i32) -> (i32, i32) {
    %c0_i32 = arith.constant 0 : i32
    %c0_i32_0 = arith.constant 0 : i32
    %c0_i32_1 = arith.constant 0 : i32
    return %c0_i32, %c0_i32_0 : i32, i32
  }
  func.func @transform_7(%arg0: i32) -> (i32, i32) {
    %c0_i32 = arith.constant 0 : i32
    %c0_i32_0 = arith.constant 0 : i32
    %c0_i32_1 = arith.constant 0 : i32
    return %c0_i32, %c0_i32_0 : i32, i32
  }
  func.func @transform_8(%arg0: i32) -> (i32, i32) {
    %c0_i32 = arith.constant 0 : i32
    %c0_i32_0 = arith.constant 0 : i32
    %c0_i32_1 = arith.constant 0 : i32
    return %c0_i32, %c0_i32_0 : i32, i32
  }
  func.func @transform_9(%arg0: i32) -> (i32, i32) {
    %c0_i32 = arith.constant 0 : i32
    %c0_i32_0 = arith.constant 0 : i32
    %c0_i32_1 = arith.constant 0 : i32
    return %c0_i32, %c0_i32_0 : i32, i32
  }
}

</mosaic_0001>

<bundles_post_ra>
// kernel: seq2seq_bilstm_lite_forward.2
= control target key start
LH: loop header
LB: loop body
LE: loop exit
PB: predicated region body
PF: predicated region fallthrough
CT: control target
= control target key end

     0   :  { %s1430_s1 = inlined_call_operand.vmem [shape: f32[128,128], index: 1, kind: input, shape index: {}]   ;;  %s1431_s0 = inlined_call_operand.vmem [shape: f32[64,128], index: 0, kind: input, shape index: {}]   ;;  %s1432_s3 = inlined_call_operand.vmem [shape: f32[128,128], index: 3, kind: input, shape index: {}]   ;;  %s1433_s5 = inlined_call_operand.vmem [shape: f32[128,128], index: 5, kind: input, shape index: {}]   ;;  %s1434_s2 = inlined_call_operand.vmem [shape: f32[1,128], index: 2, kind: input, shape index: {}]   ;;  %s1435_s7 = inlined_call_operand.vmem [shape: f32[128,128], index: 7, kind: input, shape index: {}]   ;;  %s1436_s4 = inlined_call_operand.vmem [shape: f32[1,128], index: 4, kind: input, shape index: {}]   ;;  %s1437_s6 = inlined_call_operand.vmem [shape: f32[1,128], index: 6, kind: input, shape index: {}]   ;;  %s1438_s8 = inlined_call_operand.vmem [shape: f32[1,128], index: 8, kind: input, shape index: {}]   ;;  %s1439_s9 = inlined_call_operand.vmem [shape: f32[64,128], index: 9, kind: output, shape index: {}]  }
   0x1   :  { %v40_v0 = vld [vmem:[%s1430_s1] sm:$0xff]  ;;  %v41_v1 = vld [vmem:[%s1430_s1 + $0x8] sm:$0xff]  ;;  %v42_v2 = vld [vmem:[%s1430_s1 + $0x10] sm:$0xff] }
   0x2   :  { %v936_v3 = vpack.c.bf16 %v41_v1, %v40_v0  ;;  %v43_v4 = vld [vmem:[%s1430_s1 + $0x18] sm:$0xff]  ;;  %v44_v6 = vld [vmem:[%s1430_s1 + $0x20] sm:$0xff]  ;;  %v45_v7 = vld [vmem:[%s1430_s1 + $0x28] sm:$0xff] }
   0x3   :  { %v940_v5 = vpack.c.bf16 %v43_v4, %v42_v2  ;;  %v944_v8 = vpack.c.bf16 %v45_v7, %v44_v6  ;;  %v32_v9 = vld [vmem:[%s1431_s0] sm:$0xff]  ;;  %v46_v10 = vld [vmem:[%s1430_s1 + $0x30] sm:$0xff]  ;;  %v47_v11 = vld [vmem:[%s1430_s1 + $0x38] sm:$0xff] }
   0x4   :  { %937 = vmatprep.subr.bf16.mxu0 %v936_v3  ;;  %792 = vmatprep.mubr.f32.mxu0 %v32_v9  ;;  %v168_v12 = vld [vmem:[%s1432_s3] sm:$0xff]  ;;  %v169_v13 = vld [vmem:[%s1432_s3 + $0x8] sm:$0xff]  ;;  %v170_v14 = vld [vmem:[%s1432_s3 + $0x10] sm:$0xff]  ;;  %v948_v15 = vpack.c.bf16 %v47_v11, %v46_v10 }
   0x5   :  { %939 = vmatpush3.bf16.msra.mxu0 %v936_v3  ;;  %v48_v16 = vld [vmem:[%s1430_s1 + $0x40] sm:$0xff]  ;;  %v968_v17 = vpack.c.bf16 %v169_v13, %v168_v12  ;;  %v171_v18 = vld [vmem:[%s1432_s3 + $0x18] sm:$0xff]  ;;  %v49_v19 = vld [vmem:[%s1430_s1 + $0x48] sm:$0xff] }
   0x6   :  { %941 = vmatprep.subr.bf16.mxu0 %v940_v5  ;;  %v972_v20 = vpack.c.bf16 %v171_v18, %v170_v14  ;;  %v172_v21 = vld [vmem:[%s1432_s3 + $0x20] sm:$0xff]  ;;  %v173_v22 = vld [vmem:[%s1432_s3 + $0x28] sm:$0xff]  ;;  %v952_v23 = vpack.c.bf16 %v49_v19, %v48_v16  ;;  %v50_v24 = vld [vmem:[%s1430_s1 + $0x50] sm:$0xff] }
   0x7   :  { %969 = vmatprep.subr.bf16.mxu1 %v968_v17  ;;  %v976_v25 = vpack.c.bf16 %v173_v22, %v172_v21  ;;  %v51_v26 = vld [vmem:[%s1430_s1 + $0x58] sm:$0xff]  ;;  %v174_v27 = vld [vmem:[%s1432_s3 + $0x30] sm:$0xff]  ;;  %v52_v30 = vld [vmem:[%s1430_s1 + $0x60] sm:$0xff] }
   0x8   :  { %971 = vmatpush3.bf16.msra.mxu1 %v968_v17  ;;  %v175_v28 = vld [vmem:[%s1432_s3 + $0x38] sm:$0xff]  ;;  %v956_v29 = vpack.c.bf16 %v51_v26, %v50_v24  ;;  %v53_v32 = vld [vmem:[%s1430_s1 + $0x68] sm:$0xff]  ;;  %v176_v33 = vld [vmem:[%s1432_s3 + $0x40] sm:$0xff] }
   0x9   :  { %943 = vmatpush3.bf16.msra.mxu0 %v940_v5  ;;  %973 = vmatprep.subr.bf16.mxu1 %v972_v20  ;;  %v980_v31 = vpack.c.bf16 %v175_v28, %v174_v27  ;;  %v177_v34 = vld [vmem:[%s1432_s3 + $0x48] sm:$0xff]  ;;  %v960_v35 = vpack.c.bf16 %v53_v32, %v52_v30  ;;  %v54_v36 = vld [vmem:[%s1430_s1 + $0x70] sm:$0xff]  ;;  %v55_v38 = vld [vmem:[%s1430_s1 + $0x78] sm:$0xff] }
   0xa   :  { %945 = vmatprep.subr.bf16.mxu0 %v944_v8  ;;  %v984_v37 = vpack.c.bf16 %v177_v34, %v176_v33  ;;  %v178_v39 = vld [vmem:[%s1432_s3 + $0x50] sm:$0xff]  ;;  %v179_v40 = vld [vmem:[%s1432_s3 + $0x58] sm:$0xff]  ;;  %v964_v41 = vpack.c.bf16 %v55_v38, %v54_v36  ;;  %v180_v43 = vld [vmem:[%s1432_s3 + $0x60] sm:$0xff] }
   0xb   :  { %v988_v42 = vpack.c.bf16 %v179_v40, %v178_v39  ;;  %v181_v44 = vld [vmem:[%s1432_s3 + $0x68] sm:$0xff]  ;;  %v34_v47 = vld [vmem:[%s1431_s0 + $0x10] sm:$0xff]  ;;  %v35_v48 = vld [vmem:[%s1431_s0 + $0x18] sm:$0xff] }
   0xc   :  { %975 = vmatpush3.bf16.msra.mxu1 %v972_v20  ;;  %v992_v45 = vpack.c.bf16 %v181_v44, %v180_v43  ;;  %v33_v46 = vld [vmem:[%s1431_s0 + $0x8] sm:$0xff]  ;;  %v36_v49 = vld [vmem:[%s1431_s0 + $0x20] sm:$0xff]  ;;  %v38_v51 = vld [vmem:[%s1431_s0 + $0x30] sm:$0xff] }
   0xd   :  { %947 = vmatpush3.bf16.msra.mxu0 %v944_v8  ;;  %977 = vmatprep.subr.bf16.mxu1 %v976_v25  ;;  %v37_v50 = vld [vmem:[%s1431_s0 + $0x28] sm:$0xff]  ;;  %v39_v52 = vld [vmem:[%s1431_s0 + $0x38] sm:$0xff]  ;;  %v182_v53 = vld [vmem:[%s1432_s3 + $0x70] sm:$0xff] }
   0xe   :  { %949 = vmatprep.subr.bf16.mxu0 %v948_v15  ;;  %v183_v54 = vld [vmem:[%s1432_s3 + $0x78] sm:$0xff]  ;;  %v304_v56 = vld [vmem:[%s1433_s5] sm:$0xff]  ;;  %v305_v57 = vld [vmem:[%s1433_s5 + $0x8] sm:$0xff] }
   0xf   :  { %v996_v55 = vpack.c.bf16 %v183_v54, %v182_v53  ;;  %v306_v58 = vld [vmem:[%s1433_s5 + $0x10] sm:$0xff]  ;;  %v1000_v59 = vpack.c.bf16 %v305_v57, %v304_v56  ;;  %v307_v60 = vld [vmem:[%s1433_s5 + $0x18] sm:$0xff]  ;;  %v308_v62 = vld [vmem:[%s1433_s5 + $0x20] sm:$0xff] }
  0x10   :  { %979 = vmatpush3.bf16.msra.mxu1 %v976_v25  ;;  %v1004_v61 = vpack.c.bf16 %v307_v60, %v306_v58  ;;  %v309_v63 = vld [vmem:[%s1433_s5 + $0x28] sm:$0xff]  ;;  %v310_v1 = vld [vmem:[%s1433_s5 + $0x30] sm:$0xff]  ;;  %v311_v2 = vld [vmem:[%s1433_s5 + $0x38] sm:$0xff] }
  0x11   :  { %951 = vmatpush3.bf16.msra.mxu0 %v948_v15  ;;  %981 = vmatprep.subr.bf16.mxu1 %v980_v31  ;;  %v1008_v0 = vpack.c.bf16 %v309_v63, %v308_v62  ;;  %v1012_v3 = vpack.c.bf16 %v311_v2, %v310_v1  ;;  %v312_v4 = vld [vmem:[%s1433_s5 + $0x40] sm:$0xff]  ;;  %v313_v5 = vld [vmem:[%s1433_s5 + $0x48] sm:$0xff]  ;;  %v314_v7 = vld [vmem:[%s1433_s5 + $0x50] sm:$0xff] }
  0x12   :  { %953 = vmatprep.subr.bf16.mxu0 %v952_v23  ;;  %v1016_v6 = vpack.c.bf16 %v313_v5, %v312_v4  ;;  %v315_v8 = vld [vmem:[%s1433_s5 + $0x58] sm:$0xff]  ;;  %v316_v10 = vld [vmem:[%s1433_s5 + $0x60] sm:$0xff]  ;;  %v317_v11 = vld [vmem:[%s1433_s5 + $0x68] sm:$0xff] }
  0x13   :  { %v1020_v9 = vpack.c.bf16 %v315_v8, %v314_v7  ;;  %v1024_v12 = vpack.c.bf16 %v317_v11, %v316_v10  ;;  %v660_v13 = vld [vmem:[%s1434_s2] ss:$0 sm:$0xff]  ;;  %v318_v30 = vld [vmem:[%s1433_s5 + $0x70] sm:$0xff]  ;;  %v441_v34 = vld [vmem:[%s1435_s7 + $0x8] sm:$0xff] }
  0x14   :  { %983 = vmatpush3.bf16.msra.mxu1 %v980_v31  ;;  %v319_v31 = vld [vmem:[%s1433_s5 + $0x78] sm:$0xff]  ;;  %v440_v33 = vld [vmem:[%s1435_s7] sm:$0xff]  ;;  %v445_v40 = vld [vmem:[%s1435_s7 + $0x28] sm:$0xff] }
  0x15   :  { %955 = vmatpush3.bf16.msra.mxu0 %v952_v23  ;;  %985 = vmatprep.subr.bf16.mxu1 %v984_v37  ;;  %v1028_v32 = vpack.c.bf16 %v319_v31, %v318_v30  ;;  %v1032_v36 = vpack.c.bf16 %v441_v34, %v440_v33  ;;  %v444_v39 = vld [vmem:[%s1435_s7 + $0x20] sm:$0xff]  ;;  %v447_v43 = vld [vmem:[%s1435_s7 + $0x38] sm:$0xff] }
  0x16   :  { %957 = vmatprep.subr.bf16.mxu0 %v956_v29  ;;  %v661_v54 = vld [vmem:[%s1436_s4] ss:$0 sm:$0xff] }
  0x18   :  { %987 = vmatpush3.bf16.msra.mxu1 %v984_v37  ;;  %v443_v37 = vld [vmem:[%s1435_s7 + $0x18] sm:$0xff] }
  0x19   :  { %959 = vmatpush3.bf16.msra.mxu0 %v956_v29  ;;  %989 = vmatprep.subr.bf16.mxu1 %v988_v42 }
  0x1a   :  { %961 = vmatprep.subr.bf16.mxu0 %v960_v35 }
  0x1c   :  { %991 = vmatpush3.bf16.msra.mxu1 %v988_v42  ;;  %v446_v42 = vld [vmem:[%s1435_s7 + $0x30] sm:$0xff] }
  0x1d   :  { %963 = vmatpush3.bf16.msra.mxu0 %v960_v35  ;;  %993 = vmatprep.subr.bf16.mxu1 %v992_v45  ;;  %v442_v35 = vld [vmem:[%s1435_s7 + $0x10] sm:$0xff]  ;;  %v1044_v44 = vpack.c.bf16 %v447_v43, %v446_v42  ;;  %v663_v43 = vld [vmem:[%s1438_s8] ss:$0 sm:$0xff] }
  0x1e   :  { %965 = vmatprep.subr.bf16.mxu0 %v964_v41  ;;  %v1036_v38 = vpack.c.bf16 %v443_v37, %v442_v35 }
  0x20   :  { %995 = vmatpush3.bf16.msra.mxu1 %v992_v45  ;;  %v448_v45 = vld [vmem:[%s1435_s7 + $0x40] sm:$0xff] }
  0x21   :  { %967 = vmatpush3.bf16.msra.mxu0 %v964_v41  ;;  %997 = vmatprep.subr.bf16.mxu1 %v996_v55  ;;  %v1040_v41 = vpack.c.bf16 %v445_v40, %v444_v39 }
  0x22   :  { %1001 = vmatprep.subr.bf16.mxu0 %v1000_v59 }
  0x24   :  { %793 = vmatmul.mubr.f32.vlgmr.msra.gmra.mrb[0].mxu0 %v33_v46  ;;  %999 = vmatpush3.bf16.msra.mxu1 %v996_v55  ;;  %v449_v46 = vld [vmem:[%s1435_s7 + $0x48] sm:$0xff] }
  0x25   :  { %795 = vmatprep.mubr.f32.mxu0 %v34_v47  ;;  %1003 = vmatpush3.bf16.msra.mxu0 %v1000_v59  ;;  %v1048_v47 = vpack.c.bf16 %v449_v46, %v448_v45 }
  0x26   :  { %1005 = vmatprep.subr.bf16.mxu0 %v1004_v61  ;;  %1033 = vmatprep.subr.bf16.mxu1 %v1032_v36 }
  0x28   :  { %796 = vmatmul.mubr.f32.gmra.mrb[2].mxu0 %v35_v48  ;;  %v450_v48 = vld [vmem:[%s1435_s7 + $0x50] sm:$0xff] }
  0x29   :  { %798 = vmatprep.mubr.f32.mxu0 %v36_v49  ;;  %1007 = vmatpush3.bf16.msra.mxu0 %v1004_v61  ;;  %v451_v49 = vld [vmem:[%s1435_s7 + $0x58] sm:$0xff] }
  0x2a   :  { %1009 = vmatprep.subr.bf16.mxu0 %v1008_v0 }
  0x2c   :  { %799 = vmatmul.mubr.f32.gmra.mrb[4].mxu0 %v37_v50  ;;  %v1052_v50 = vpack.c.bf16 %v451_v49, %v450_v48 }
  0x2d   :  { %801 = vmatprep.mubr.f32.mxu0 %v38_v51  ;;  %1011 = vmatpush3.bf16.msra.mxu0 %v1008_v0  ;;  %v452_v51 = vld [vmem:[%s1435_s7 + $0x60] sm:$0xff] }
  0x2e   :  { %1013 = vmatprep.subr.bf16.mxu0 %v1012_v3 }
  0x30   :  { %802 = vmatmul.mubr.f32.gmra.mrb[6].mxu0 %v39_v52  ;;  %v453_v52 = vld [vmem:[%s1435_s7 + $0x68] sm:$0xff] }
  0x31   :  { %1015 = vmatpush3.bf16.msra.mxu0 %v1012_v3  ;;  %v1056_v53 = vpack.c.bf16 %v453_v52, %v452_v51 }
  0x32   :  { %1017 = vmatprep.subr.bf16.mxu0 %v1016_v6 }
  0x35   :  { %1019 = vmatpush3.bf16.msra.mxu0 %v1016_v6 }
  0x36   :  { %1021 = vmatprep.subr.bf16.mxu0 %v1020_v9 }
  0x39   :  { %1023 = vmatpush3.bf16.msra.mxu0 %v1020_v9 }
  0x3a   :  { %1025 = vmatprep.subr.bf16.mxu0 %v1024_v12 }
  0x3d   :  { %1027 = vmatpush3.bf16.msra.mxu0 %v1024_v12 }
  0x3e   :  { %1029 = vmatprep.subr.bf16.mxu0 %v1028_v32 }
  0x41   :  { %1031 = vmatpush3.bf16.msra.mxu0 %v1028_v32 }
  0xf7   :  { %v794_v14 = vpop.f32.mrb[0].mxu0 }
  0xf8   :  { %v129_v15 = vpop.f32.mrb[1].mxu0  ;;  %v135_v17 = vadd.f32 %v794_v14, %v660_v13 }
  0xf9   :  { %v130_v16 = vadd.f32 %v660_v13, %v129_v15  ;;  %v454_v15 = vld [vmem:[%s1435_s7 + $0x70] sm:$0xff] }
  0xfb   :  { %v797_v18 = vpop.f32.mrb[2].mxu0  ;;  %836 = vmatprep.mubr.f32.mxu1 %v130_v16  ;;  %v455_v16 = vld [vmem:[%s1435_s7 + $0x78] sm:$0xff] }
  0xfc   :  { %v139_v19 = vpop.f32.mrb[3].mxu0  ;;  %837 = vmatmul.mubr.f32.vlgmr.msra.gmra.mrb[0].mxu1 %v135_v17  ;;  %v145_v21 = vadd.f32 %v797_v18, %v660_v13  ;;  %v1060_v17 = vpack.c.bf16 %v455_v16, %v454_v15  ;;  %v662_v18 = vld [vmem:[%s1437_s6] ss:$0 sm:$0xff] }
  0xfd   :  { %v140_v20 = vadd.f32 %v660_v13, %v139_v19  ;;  %1035 = vmatpush3.bf16.msra.mxu1 %v1032_v36 }
  0xfe   :  { %1037 = vmatprep.subr.bf16.mxu1 %v1036_v38 }
  0xff   :  { %v800_v22 = vpop.f32.mrb[4].mxu0  ;;  %839 = vmatprep.mubr.f32.mxu1 %v140_v20 }
 0x100   :  { %v155_v23 = vadd.f32 %v800_v22, %v660_v13  ;;  %v149_v24 = vpop.f32.mrb[5].mxu0  ;;  %840 = vmatmul.mubr.f32.gmra.mrb[2].mxu1 %v145_v21 }
 0x101   :  { %v150_v25 = vadd.f32 %v660_v13, %v149_v24  ;;  %1039 = vmatpush3.bf16.msra.mxu1 %v1036_v38 }
 0x102   :  { %1041 = vmatprep.subr.bf16.mxu1 %v1040_v41 }
 0x103   :  { %v803_v26 = vpop.f32.mrb[6].mxu0  ;;  %842 = vmatprep.mubr.f32.mxu1 %v150_v25 }
 0x104   :  { %v165_v27 = vadd.f32 %v803_v26, %v660_v13  ;;  %v159_v28 = vpop.f32.mrb[7].mxu0  ;;  %843 = vmatmul.mubr.f32.gmra.mrb[4].mxu1 %v155_v23 }
 0x105   :  { %v160_v29 = vadd.f32 %v660_v13, %v159_v28  ;;  %1043 = vmatpush3.bf16.msra.mxu1 %v1040_v41 }
 0x106   :  { %1045 = vmatprep.subr.bf16.mxu1 %v1044_v44 }
 0x107   :  { %845 = vmatprep.mubr.f32.mxu1 %v160_v29 }
 0x108   :  { %846 = vmatmul.mubr.f32.gmra.mrb[6].mxu1 %v165_v27 }
 0x109   :  { %1047 = vmatpush3.bf16.msra.mxu1 %v1044_v44 }
 0x10a   :  { %1049 = vmatprep.subr.bf16.mxu1 %v1048_v47 }
 0x10d   :  { %1051 = vmatpush3.bf16.msra.mxu1 %v1048_v47 }
 0x10e   :  { %1053 = vmatprep.subr.bf16.mxu1 %v1052_v50 }
 0x111   :  { %1055 = vmatpush3.bf16.msra.mxu1 %v1052_v50 }
 0x112   :  { %1057 = vmatprep.subr.bf16.mxu1 %v1056_v53 }
 0x115   :  { %1059 = vmatpush3.bf16.msra.mxu1 %v1056_v53 }
 0x116   :  { %1061 = vmatprep.subr.bf16.mxu1 %v1060_v17 }
 0x119   :  { %1063 = vmatpush3.bf16.msra.mxu1 %v1060_v17 }
 0x1cf   :  { %v838_v55 = vpop.f32.mrb[0].mxu1 }
 0x1d0   :  { %v263_v56 = vadd.f32 %v838_v55, %v661_v54  ;;  %v257_v57 = vpop.f32.mrb[1].mxu1 }
 0x1d1   :  { %v258_v58 = vadd.f32 %v661_v54, %v257_v57 }
 0x1d2   :  { %v297_v61 = vmax.f32 %v263_v56, 0.0 }
 0x1d3   :  { %v296_v59 = vmax.f32 %v258_v58, 0.0  ;;  %v841_v60 = vpop.f32.mrb[2].mxu1 }
 0x1d4   :  { %v273_v62 = vadd.f32 %v841_v60, %v661_v54  ;;  %v267_v63 = vpop.f32.mrb[3].mxu1 }
 0x1d5   :  { %v268_v0 = vadd.f32 %v661_v54, %v267_v63  ;;  %880 = vmatprep.mubr.f32.mxu0 %v296_v59 }
 0x1d6   :  { %881 = vmatmul.mubr.f32.vlgmr.msra.gmra.mrb[8].mxu0 %v297_v61  ;;  %v299_v3 = vmax.f32 %v273_v62, 0.0 }
 0x1d7   :  { %v298_v1 = vmax.f32 %v268_v0, 0.0  ;;  %v844_v2 = vpop.f32.mrb[4].mxu1 }
 0x1d8   :  { %v283_v4 = vadd.f32 %v844_v2, %v661_v54  ;;  %v277_v5 = vpop.f32.mrb[5].mxu1 }
 0x1d9   :  { %v278_v6 = vadd.f32 %v661_v54, %v277_v5  ;;  %883 = vmatprep.mubr.f32.mxu0 %v298_v1 }
 0x1da   :  { %v301_v7 = vmax.f32 %v283_v4, 0.0  ;;  %884 = vmatmul.mubr.f32.gmra.mrb[10].mxu0 %v299_v3 }
 0x1db   :  { %v300_v8 = vmax.f32 %v278_v6, 0.0  ;;  %v847_v9 = vpop.f32.mrb[6].mxu1 }
 0x1dc   :  { %v293_v10 = vadd.f32 %v847_v9, %v661_v54  ;;  %v287_v11 = vpop.f32.mrb[7].mxu1 }
 0x1dd   :  { %v288_v12 = vadd.f32 %v661_v54, %v287_v11  ;;  %886 = vmatprep.mubr.f32.mxu0 %v300_v8 }
 0x1de   :  { %v303_v13 = vmax.f32 %v293_v10, 0.0  ;;  %887 = vmatmul.mubr.f32.gmra.mrb[12].mxu0 %v301_v7 }
 0x1df   :  { %v302_v14 = vmax.f32 %v288_v12, 0.0 }
 0x1e1   :  { %889 = vmatprep.mubr.f32.mxu0 %v302_v14 }
 0x1e2   :  { %890 = vmatmul.mubr.f32.gmra.mrb[14].mxu0 %v303_v13 }
 0x2a9   :  { %v882_v19 = vpop.f32.mrb[8].mxu0 }
 0x2aa   :  { %v399_v20 = vadd.f32 %v882_v19, %v662_v18  ;;  %v393_v21 = vpop.f32.mrb[9].mxu0 }
 0x2ab   :  { %v394_v22 = vadd.f32 %v662_v18, %v393_v21 }
 0x2ac   :  { %v433_v25 = vmax.f32 %v399_v20, 0.0 }
 0x2ad   :  { %v432_v23 = vmax.f32 %v394_v22, 0.0  ;;  %v885_v24 = vpop.f32.mrb[10].mxu0 }
 0x2ae   :  { %v409_v26 = vadd.f32 %v885_v24, %v662_v18  ;;  %v403_v27 = vpop.f32.mrb[11].mxu0 }
 0x2af   :  { %v404_v28 = vadd.f32 %v662_v18, %v403_v27  ;;  %924 = vmatprep.mubr.f32.mxu1 %v432_v23 }
 0x2b0   :  { %925 = vmatmul.mubr.f32.vlgmr.msra.gmra.mrb[8].mxu1 %v433_v25  ;;  %v435_v31 = vmax.f32 %v409_v26, 0.0 }
 0x2b1   :  { %v434_v29 = vmax.f32 %v404_v28, 0.0  ;;  %v888_v30 = vpop.f32.mrb[12].mxu0 }
 0x2b2   :  { %v419_v32 = vadd.f32 %v888_v30, %v662_v18  ;;  %v413_v33 = vpop.f32.mrb[13].mxu0 }
 0x2b3   :  { %v414_v34 = vadd.f32 %v662_v18, %v413_v33  ;;  %927 = vmatprep.mubr.f32.mxu1 %v434_v29 }
 0x2b4   :  { %928 = vmatmul.mubr.f32.gmra.mrb[10].mxu1 %v435_v31  ;;  %v437_v37 = vmax.f32 %v419_v32, 0.0 }
 0x2b5   :  { %v436_v35 = vmax.f32 %v414_v34, 0.0  ;;  %v891_v36 = vpop.f32.mrb[14].mxu0 }
 0x2b6   :  { %v429_v38 = vadd.f32 %v891_v36, %v662_v18  ;;  %v423_v39 = vpop.f32.mrb[15].mxu0 }
 0x2b7   :  { %v424_v40 = vadd.f32 %v662_v18, %v423_v39  ;;  %930 = vmatprep.mubr.f32.mxu1 %v436_v35 }
 0x2b8   :  { %931 = vmatmul.mubr.f32.gmra.mrb[12].mxu1 %v437_v37  ;;  %v439_v42 = vmax.f32 %v429_v38, 0.0 }
 0x2b9   :  { %v438_v41 = vmax.f32 %v424_v40, 0.0 }
 0x2bb   :  { %933 = vmatprep.mubr.f32.mxu1 %v438_v41 }
 0x2bc   :  { %934 = vmatmul.mubr.f32.gmra.mrb[14].mxu1 %v439_v42 }
 0x383   :  { %v926_v44 = vpop.f32.mrb[8].mxu1 }
 0x384   :  { %v535_v45 = vadd.f32 %v926_v44, %v663_v43  ;;  %v529_v46 = vpop.f32.mrb[9].mxu1 }
 0x385   :  { %v530_v48 = vadd.f32 %v663_v43, %v529_v46 }
 0x386   :  { %570 = vmax.xlane.f32.xlu0 %v535_v45 }
 0x387   :  { %v929_v47 = vpop.f32.mrb[10].mxu1 }
 0x388   :  { %v545_v49 = vadd.f32 %v929_v47, %v663_v43  ;;  %v539_v50 = vpop.f32.mrb[11].mxu1 }
 0x389   :  { %v540_v52 = vadd.f32 %v663_v43, %v539_v50 }
 0x38a   :  { %574 = vmax.xlane.f32.xlu1 %v545_v49  ;;  %568 = vmax.xlane.f32.xlu0 %v530_v48 }
 0x38b   :  { %v932_v51 = vpop.f32.mrb[12].mxu1 }
 0x38c   :  { %v549_v53 = vpop.f32.mrb[13].mxu1  ;;  %v555_v56 = vadd.f32 %v932_v51, %v663_v43 }
 0x38d   :  { %v550_v54 = vadd.f32 %v663_v43, %v549_v53 }
 0x38e   :  { %572 = vmax.xlane.f32.xlu1 %v540_v52 }
 0x38f   :  { %v935_v55 = vpop.f32.mrb[14].mxu1  ;;  %576 = vmax.xlane.f32.xlu0 %v550_v54 }
 0x390   :  { %v559_v57 = vpop.f32.mrb[15].mxu1  ;;  %v565_v59 = vadd.f32 %v935_v55, %v663_v43 }
 0x391   :  { %v560_v58 = vadd.f32 %v663_v43, %v559_v57 }
 0x392   :  { %578 = vmax.xlane.f32.xlu1 %v555_v56 }
 0x393   :  { %580 = vmax.xlane.f32.xlu0 %v560_v58 }
 0x396   :  { %582 = vmax.xlane.f32.xlu1 %v565_v59 }
 0x413   :  { %v571_v60 = vpop.xlane.xlu0 %570 }
 0x414   :  { %v1374_v61 = vsub.f32 %v535_v45, %v571_v60 }
 0x416   :  { %v594_v62 = vmul.f32 1.442695, %v1374_v61 }
 0x417   :  { %v575_v63 = vpop.xlane.xlu1 %574  ;;  %v569_v0 = vpop.xlane.xlu0 %568 }
 0x418   :  { %1064 = vpow2.f32 %v594_v62  ;;  %v1377_v1 = vsub.f32 %v545_v49, %v575_v63  ;;  %v1379_v2 = vsub.f32 %v530_v48, %v569_v0 }
 0x41a   :  { %v598_v3 = vmul.f32 1.442695, %v1377_v1  ;;  %v592_v4 = vmul.f32 1.442695, %v1379_v2 }
 0x41b   :  { %v573_v5 = vpop.xlane.xlu1 %572 }
 0x41c   :  { %1066 = vpow2.f32 %v598_v3  ;;  %v1383_v6 = vsub.f32 %v540_v52, %v573_v5  ;;  %v577_v7 = vpop.xlane.xlu0 %576 }
 0x41d   :  { %1068 = vpow2.f32 %v592_v4  ;;  %v1385_v8 = vsub.f32 %v550_v54, %v577_v7 }
 0x41e   :  { %v596_v9 = vmul.f32 1.442695, %v1383_v6 }
 0x41f   :  { %v579_v10 = vpop.xlane.xlu1 %578  ;;  %v600_v13 = vmul.f32 1.442695, %v1385_v8 }
 0x420   :  { %1070 = vpow2.f32 %v596_v9  ;;  %v1388_v11 = vsub.f32 %v555_v56, %v579_v10  ;;  %v581_v12 = vpop.xlane.xlu0 %580 }
 0x421   :  { %v1391_v14 = vsub.f32 %v560_v58, %v581_v12 }
 0x422   :  { %v1065_v15 = vpop.eup %1064  ;;  %v602_v16 = vmul.f32 1.442695, %v1388_v11 }
 0x423   :  { %610 = vadd.xlane.f32.xlu1 %v1065_v15  ;;  %v583_v17 = vpop.xlane.xlu1 %582  ;;  %v604_v19 = vmul.f32 1.442695, %v1391_v14 }
 0x424   :  { %1072 = vpow2.f32 %v602_v16  ;;  %v1394_v18 = vsub.f32 %v565_v59, %v583_v17 }
 0x425   :  { %1074 = vpow2.f32 %v600_v13 }
 0x426   :  { %v1067_v20 = vpop.eup %1066  ;;  %v606_v21 = vmul.f32 1.442695, %v1394_v18 }
 0x427   :  { %v1069_v22 = vpop.eup %1068  ;;  %614 = vadd.xlane.f32.xlu1 %v1067_v20 }
 0x428   :  { %1076 = vpow2.f32 %v606_v21  ;;  %608 = vadd.xlane.f32.xlu0 %v1069_v22 }
 0x429   :  { %1078 = vpow2.f32 %v604_v19 }
 0x42a   :  { %v1071_v23 = vpop.eup %1070 }
 0x42c   :  { %612 = vadd.xlane.f32.xlu0 %v1071_v23 }
 0x42e   :  { %v1073_v24 = vpop.eup %1072 }
 0x42f   :  { %v1075_v25 = vpop.eup %1074  ;;  %618 = vadd.xlane.f32.xlu1 %v1073_v24 }
 0x430   :  { %616 = vadd.xlane.f32.xlu0 %v1075_v25 }
 0x432   :  { %v1077_v26 = vpop.eup %1076 }
 0x433   :  { %v1079_v27 = vpop.eup %1078  ;;  %622 = vadd.xlane.f32.xlu1 %v1077_v26 }
 0x434   :  { %620 = vadd.xlane.f32.xlu0 %v1079_v27 }
 0x4b0   :  { %v611_v28 = vpop.xlane.xlu1 %610 }
 0x4b1   :  { %1080 = vlog2.f32 %v611_v28 }
 0x4b4   :  { %v615_v29 = vpop.xlane.xlu1 %614 }
 0x4b5   :  { %1082 = vlog2.f32 %v615_v29  ;;  %v609_v30 = vpop.xlane.xlu0 %608 }
 0x4b6   :  { %1084 = vlog2.f32 %v609_v30 }
 0x4b9   :  { %v613_v31 = vpop.xlane.xlu0 %612 }
 0x4ba   :  { %1086 = vlog2.f32 %v613_v31 }
 0x4bb   :  { %v1081_v32 = vpop.eup %1080 }
 0x4bc   :  { %v627_v33 = vmul.f32 0.6931472, %v1081_v32  ;;  %v619_v34 = vpop.xlane.xlu1 %618 }
 0x4bd   :  { %1088 = vlog2.f32 %v619_v34  ;;  %v617_v35 = vpop.xlane.xlu0 %616 }
 0x4be   :  { %v641_v36 = vsub.f32 %v1374_v61, %v627_v33  ;;  %1090 = vlog2.f32 %v617_v35 }
 0x4bf   :  { %v1083_v37 = vpop.eup %1082 }
 0x4c0   :  { %v1085_v38 = vpop.eup %1084  ;;  %649 = vst [vmem:[%s1439_s9 + $0x8] sm:$0xff] %v641_v36  ;;  %v631_v39 = vmul.f32 0.6931472, %v1083_v37  ;;  %v623_v40 = vpop.xlane.xlu1 %622 }
 0x4c1   :  { %v625_v41 = vmul.f32 0.6931472, %v1085_v38  ;;  %1092 = vlog2.f32 %v623_v40  ;;  %v621_v42 = vpop.xlane.xlu0 %620 }
 0x4c2   :  { %v643_v43 = vsub.f32 %v1377_v1, %v631_v39  ;;  %1094 = vlog2.f32 %v621_v42 }
 0x4c3   :  { %v640_v44 = vsub.f32 %v1379_v2, %v625_v41 }
 0x4c4   :  { %v1087_v45 = vpop.eup %1086  ;;  %651 = vst [vmem:[%s1439_s9 + $0x18] sm:$0xff] %v643_v43 }
 0x4c5   :  { %648 = vst [vmem:[%s1439_s9] sm:$0xff] %v640_v44  ;;  %v629_v46 = vmul.f32 0.6931472, %v1087_v45 }
 0x4c7   :  { %v1089_v47 = vpop.eup %1088  ;;  %v642_v48 = vsub.f32 %v1383_v6, %v629_v46 }
 0x4c8   :  { %v1091_v49 = vpop.eup %1090  ;;  %v635_v50 = vmul.f32 0.6931472, %v1089_v47 }
 0x4c9   :  { %650 = vst [vmem:[%s1439_s9 + $0x10] sm:$0xff] %v642_v48  ;;  %v633_v51 = vmul.f32 0.6931472, %v1091_v49 }
 0x4ca   :  { %v645_v52 = vsub.f32 %v1388_v11, %v635_v50 }
 0x4cb   :  { %v1093_v53 = vpop.eup %1092  ;;  %v644_v54 = vsub.f32 %v1385_v8, %v633_v51 }
 0x4cc   :  { %v1095_v55 = vpop.eup %1094  ;;  %653 = vst [vmem:[%s1439_s9 + $0x28] sm:$0xff] %v645_v52  ;;  %v639_v56 = vmul.f32 0.6931472, %v1093_v53 }
 0x4cd   :  { %652 = vst [vmem:[%s1439_s9 + $0x20] sm:$0xff] %v644_v54  ;;  %v637_v57 = vmul.f32 0.6931472, %v1095_v55 }
 0x4ce   :  { %v647_v58 = vsub.f32 %v1394_v18, %v639_v56 }
 0x4cf   :  { %v646_v59 = vsub.f32 %v1391_v14, %v637_v57 }
 0x4d0   :  { %655 = vst [vmem:[%s1439_s9 + $0x38] sm:$0xff] %v647_v58 }
 0x4d1   :  { %654 = vst [vmem:[%s1439_s9 + $0x30] sm:$0xff] %v646_v59 }

// kernel: seq2seq_bilstm_lite_forward.3
= control target key start
LH: loop header
LB: loop body
LE: loop exit
PB: predicated region body
PF: predicated region fallthrough
CT: control target
= control target key end

     0   :  { %v799_v0 = vmov 0   ;;  %v43_v45 = vlaneseq  ;;  %vm245_vm0 = vcmask 523264   ;;  %v800_v49 = vmov 0.0   ;;  %s1130_s0 = inlined_call_operand.vmem [shape: s32[256,1], index: 0, kind: input, shape index: {}]   ;;  %s1131_s1 = inlined_call_operand.vmem [shape: f32[64,128], index: 1, kind: input, shape index: {}]   ;;  %s1132_s2 = inlined_call_operand.vmem [shape: f32[256,128], index: 2, kind: output, shape index: {}]  }
   0x1   :  { %798 = vset.pattern.permute.xlu1 %v799_v0  ;;  %797 = vset.pattern.permute.xlu0 %v799_v0  ;;  %v12_v1 = vld [vmem:[%s1130_s0 + $0x8] sm:$0xff]  ;;  %v11_v2 = vld [vmem:[%s1130_s0] sm:$0xff]  ;;  %v29_v5 = vld [vmem:[%s1130_s0 + $0x90] sm:$0xff] }
   0x2   :  { %49 = vperm.xlu1 %798, %v12_v1   ;;  %46 = vperm.xlu0 %797, %v11_v2   ;;  %v28_v3 = vld [vmem:[%s1130_s0 + $0x88] sm:$0xff]  ;;  %v27_v4 = vld [vmem:[%s1130_s0 + $0x80] sm:$0xff]  ;;  %v13_v6 = vld [vmem:[%s1130_s0 + $0x10] sm:$0xff]  ;;  %v936_v46 = vand.u32 127, %v43_v45 }
   0x3   :  { %v30_v7 = vld [vmem:[%s1130_s0 + $0x98] sm:$0xff]  ;;  %v237_v9 = vld [vmem:[%s1131_s1] sm:$0xff]  ;;  %v238_v10 = vld [vmem:[%s1131_s1 + $0x8] sm:$0xff] }
   0x4   :  { %v14_v8 = vld [vmem:[%s1130_s0 + $0x18] sm:$0xff]  ;;  %v239_v11 = vld [vmem:[%s1131_s1 + $0x10] sm:$0xff]  ;;  %v771_v13 = vpack.c.bf16 %v238_v10, %v237_v9  ;;  %v241_v15 = vld [vmem:[%s1131_s1 + $0x20] sm:$0xff] }
   0x5   :  { %v240_v12 = vld [vmem:[%s1131_s1 + $0x18] sm:$0xff]  ;;  %v242_v16 = vld [vmem:[%s1131_s1 + $0x28] sm:$0xff]  ;;  %v31_v17 = vld [vmem:[%s1130_s0 + $0xa0] sm:$0xff] }
   0x6   :  { %97 = vperm.xlu1 %798, %v28_v3   ;;  %94 = vperm.xlu0 %797, %v27_v4   ;;  %v775_v14 = vpack.c.bf16 %v240_v12, %v239_v11  ;;  %v15_v18 = vld [vmem:[%s1130_s0 + $0x20] sm:$0xff]  ;;  %v779_v19 = vpack.c.bf16 %v242_v16, %v241_v15  ;;  %v243_v20 = vld [vmem:[%s1131_s1 + $0x30] sm:$0xff]  ;;  %v244_v21 = vld [vmem:[%s1131_s1 + $0x38] sm:$0xff] }
   0x7   :  { %772 = vmatprep.subr.bf16.mxu0 %v771_v13  ;;  %787 = vmatprep.subr.bf16.mxu1 %v771_v13  ;;  %v32_v22 = vld [vmem:[%s1130_s0 + $0xa8] sm:$0xff]  ;;  %v783_v24 = vpack.c.bf16 %v244_v21, %v243_v20  ;;  %v33_v25 = vld [vmem:[%s1130_s0 + $0xb0] sm:$0xff]  ;;  %v34_v27 = vld [vmem:[%s1130_s0 + $0xb8] sm:$0xff] }
   0x8   :  { %774 = vmatpush3.bf16.msra.mxu0 %v771_v13  ;;  %791 = vmatpush3.bf16.msra.mxu1 %v771_v13  ;;  %v16_v23 = vld [vmem:[%s1130_s0 + $0x28] sm:$0xff]  ;;  %v17_v26 = vld [vmem:[%s1130_s0 + $0x30] sm:$0xff]  ;;  %v18_v28 = vld [vmem:[%s1130_s0 + $0x38] sm:$0xff] }
   0x9   :  { %776 = vmatprep.subr.bf16.mxu0 %v775_v14  ;;  %788 = vmatprep.subr.bf16.mxu1 %v775_v14  ;;  %v35_v29 = vld [vmem:[%s1130_s0 + $0xc0] sm:$0xff]  ;;  %v36_v31 = vld [vmem:[%s1130_s0 + $0xc8] sm:$0xff]  ;;  %v37_v33 = vld [vmem:[%s1130_s0 + $0xd0] sm:$0xff] }
   0xa   :  { %100 = vperm.xlu1 %798, %v29_v5   ;;  %52 = vperm.xlu0 %797, %v13_v6   ;;  %v19_v30 = vld [vmem:[%s1130_s0 + $0x40] sm:$0xff]  ;;  %v20_v32 = vld [vmem:[%s1130_s0 + $0x48] sm:$0xff]  ;;  %v21_v34 = vld [vmem:[%s1130_s0 + $0x50] sm:$0xff] }
   0xb   :  { %v38_v35 = vld [vmem:[%s1130_s0 + $0xd8] sm:$0xff]  ;;  %v39_v37 = vld [vmem:[%s1130_s0 + $0xe0] sm:$0xff]  ;;  %v40_v39 = vld [vmem:[%s1130_s0 + $0xe8] sm:$0xff] }
   0xc   :  { %778 = vmatpush3.bf16.msra.mxu0 %v775_v14  ;;  %792 = vmatpush3.bf16.msra.mxu1 %v775_v14  ;;  %v22_v36 = vld [vmem:[%s1130_s0 + $0x58] sm:$0xff]  ;;  %v23_v38 = vld [vmem:[%s1130_s0 + $0x60] sm:$0xff]  ;;  %v24_v40 = vld [vmem:[%s1130_s0 + $0x68] sm:$0xff] }
   0xd   :  { %780 = vmatprep.subr.bf16.mxu0 %v779_v19  ;;  %789 = vmatprep.subr.bf16.mxu1 %v779_v19  ;;  %v41_v41 = vld [vmem:[%s1130_s0 + $0xf0] sm:$0xff]  ;;  %v42_v43 = vld [vmem:[%s1130_s0 + $0xf8] sm:$0xff] }
   0xe   :  { %103 = vperm.xlu1 %798, %v30_v7   ;;  %55 = vperm.xlu0 %797, %v14_v8   ;;  %v25_v42 = vld [vmem:[%s1130_s0 + $0x70] sm:$0xff]  ;;  %v26_v44 = vld [vmem:[%s1130_s0 + $0x78] sm:$0xff] }
  0x10   :  { %782 = vmatpush3.bf16.msra.mxu0 %v779_v19  ;;  %793 = vmatpush3.bf16.msra.mxu1 %v779_v19 }
  0x11   :  { %784 = vmatprep.subr.bf16.mxu0 %v783_v24  ;;  %790 = vmatprep.subr.bf16.mxu1 %v783_v24 }
  0x12   :  { %106 = vperm.xlu1 %798, %v31_v17   ;;  %58 = vperm.xlu0 %797, %v15_v18  }
  0x14   :  { %786 = vmatpush3.bf16.msra.mxu0 %v783_v24  ;;  %794 = vmatpush3.bf16.msra.mxu1 %v783_v24 }
  0x16   :  { %109 = vperm.xlu1 %798, %v32_v22   ;;  %61 = vperm.xlu0 %797, %v16_v23  }
  0x1a   :  { %112 = vperm.xlu1 %798, %v33_v25   ;;  %64 = vperm.xlu0 %797, %v17_v26  }
  0x1e   :  { %115 = vperm.xlu1 %798, %v34_v27   ;;  %67 = vperm.xlu0 %797, %v18_v28  }
  0x22   :  { %118 = vperm.xlu1 %798, %v35_v29   ;;  %70 = vperm.xlu0 %797, %v19_v30  }
  0x26   :  { %121 = vperm.xlu1 %798, %v36_v31   ;;  %73 = vperm.xlu0 %797, %v20_v32  }
  0x2a   :  { %124 = vperm.xlu1 %798, %v37_v33   ;;  %76 = vperm.xlu0 %797, %v21_v34  }
  0x2e   :  { %127 = vperm.xlu1 %798, %v38_v35   ;;  %79 = vperm.xlu0 %797, %v22_v36  }
  0x32   :  { %130 = vperm.xlu1 %798, %v39_v37   ;;  %82 = vperm.xlu0 %797, %v23_v38  }
  0x36   :  { %133 = vperm.xlu1 %798, %v40_v39   ;;  %85 = vperm.xlu0 %797, %v24_v40  }
  0x3a   :  { %136 = vperm.xlu1 %798, %v41_v41   ;;  %88 = vperm.xlu0 %797, %v25_v42  }
  0x3e   :  { %139 = vperm.xlu1 %798, %v42_v43   ;;  %91 = vperm.xlu0 %797, %v26_v44  }
  0x81   :  { %v50_v47 = vpop.permute.xlu1 %49  ;;  %v47_v48 = vpop.permute.xlu0 %46 }
  0x82   :  { %vm142_vm1 = vcmp.eq.s32.totalorder %v936_v46, %v50_v47  ;;  %vm141_vm2 = vcmp.eq.s32.totalorder %v936_v46, %v47_v48 }
  0x83   :  { %v604_v50 = vsel %vm142_vm1, 1.0, %v800_v49  ;;  %v603_v51 = vsel %vm141_vm2, 1.0, %v800_v49 }
  0x84   :  { %723 = vmatprep.mubr.msk.f32.mxu0 %vm245_vm0, %v603_v51 }
  0x85   :  { %v98_v52 = vpop.permute.xlu1 %97  ;;  %724 = vmatmul.mubr.msk.f32.vlgmr.msra.gmra.mrb[0].mxu0 %vm245_vm0, %v604_v50  ;;  %v95_v53 = vpop.permute.xlu0 %94 }
  0x86   :  { %vm158_vm3 = vcmp.eq.s32.totalorder %v936_v46, %v98_v52  ;;  %vm157_vm4 = vcmp.eq.s32.totalorder %v936_v46, %v95_v53 }
  0x87   :  { %v620_v54 = vsel %vm158_vm3, 1.0, %v800_v49  ;;  %v619_v55 = vsel %vm157_vm4, 1.0, %v800_v49 }
  0x88   :  { %747 = vmatprep.mubr.msk.f32.mxu1 %vm245_vm0, %v619_v55 }
  0x89   :  { %v101_v56 = vpop.permute.xlu1 %100  ;;  %748 = vmatmul.mubr.msk.f32.vlgmr.msra.gmra.mrb[0].mxu1 %vm245_vm0, %v620_v54  ;;  %v53_v57 = vpop.permute.xlu0 %52 }
  0x8a   :  { %vm159_vm5 = vcmp.eq.s32.totalorder %v936_v46, %v101_v56  ;;  %vm143_vm6 = vcmp.eq.s32.totalorder %v936_v46, %v53_v57 }
  0x8b   :  { %v621_v58 = vsel %vm159_vm5, 1.0, %v800_v49  ;;  %v605_v59 = vsel %vm143_vm6, 1.0, %v800_v49 }
  0x8c   :  { %726 = vmatprep.mubr.msk.f32.mxu0 %vm245_vm0, %v605_v59  ;;  %750 = vmatprep.mubr.msk.f32.mxu1 %vm245_vm0, %v621_v58 }
  0x8d   :  { %v104_v60 = vpop.permute.xlu1 %103  ;;  %v56_v61 = vpop.permute.xlu0 %55 }
  0x8e   :  { %vm160_vm7 = vcmp.eq.s32.totalorder %v936_v46, %v104_v60  ;;  %vm144_vm8 = vcmp.eq.s32.totalorder %v936_v46, %v56_v61 }
  0x8f   :  { %v622_v62 = vsel %vm160_vm7, 1.0, %v800_v49  ;;  %v606_v63 = vsel %vm144_vm8, 1.0, %v800_v49 }
  0x90   :  { %727 = vmatmul.mubr.msk.f32.gmra.mrb[2].mxu0 %vm245_vm0, %v606_v63  ;;  %751 = vmatmul.mubr.msk.f32.gmra.mrb[2].mxu1 %vm245_vm0, %v622_v62 }
  0x91   :  { %v107_v0 = vpop.permute.xlu1 %106  ;;  %v59_v1 = vpop.permute.xlu0 %58 }
  0x92   :  { %vm161_vm9 = vcmp.eq.s32.totalorder %v936_v46, %v107_v0  ;;  %vm145_vm10 = vcmp.eq.s32.totalorder %v936_v46, %v59_v1 }
  0x93   :  { %v623_v2 = vsel %vm161_vm9, 1.0, %v800_v49  ;;  %v607_v3 = vsel %vm145_vm10, 1.0, %v800_v49 }
  0x94   :  { %729 = vmatprep.mubr.msk.f32.mxu0 %vm245_vm0, %v607_v3  ;;  %753 = vmatprep.mubr.msk.f32.mxu1 %vm245_vm0, %v623_v2 }
  0x95   :  { %v110_v4 = vpop.permute.xlu1 %109  ;;  %v62_v5 = vpop.permute.xlu0 %61 }
  0x96   :  { %vm162_vm11 = vcmp.eq.s32.totalorder %v936_v46, %v110_v4  ;;  %vm146_vm12 = vcmp.eq.s32.totalorder %v936_v46, %v62_v5 }
  0x97   :  { %v624_v6 = vsel %vm162_vm11, 1.0, %v800_v49  ;;  %v608_v7 = vsel %vm146_vm12, 1.0, %v800_v49 }
  0x98   :  { %730 = vmatmul.mubr.msk.f32.gmra.mrb[4].mxu0 %vm245_vm0, %v608_v7  ;;  %754 = vmatmul.mubr.msk.f32.gmra.mrb[4].mxu1 %vm245_vm0, %v624_v6 }
  0x99   :  { %v113_v8 = vpop.permute.xlu1 %112  ;;  %v65_v9 = vpop.permute.xlu0 %64 }
  0x9a   :  { %vm163_vm13 = vcmp.eq.s32.totalorder %v936_v46, %v113_v8  ;;  %vm147_vm14 = vcmp.eq.s32.totalorder %v936_v46, %v65_v9 }
  0x9b   :  { %v625_v10 = vsel %vm163_vm13, 1.0, %v800_v49  ;;  %v609_v11 = vsel %vm147_vm14, 1.0, %v800_v49 }
  0x9c   :  { %732 = vmatprep.mubr.msk.f32.mxu0 %vm245_vm0, %v609_v11  ;;  %756 = vmatprep.mubr.msk.f32.mxu1 %vm245_vm0, %v625_v10 }
  0x9d   :  { %v116_v12 = vpop.permute.xlu1 %115  ;;  %v68_v13 = vpop.permute.xlu0 %67 }
  0x9e   :  { %vm164_vm15 = vcmp.eq.s32.totalorder %v936_v46, %v116_v12  ;;  %vm148_vm1 = vcmp.eq.s32.totalorder %v936_v46, %v68_v13 }
  0x9f   :  { %v626_v14 = vsel %vm164_vm15, 1.0, %v800_v49  ;;  %v610_v15 = vsel %vm148_vm1, 1.0, %v800_v49 }
  0xa0   :  { %733 = vmatmul.mubr.msk.f32.gmra.mrb[6].mxu0 %vm245_vm0, %v610_v15  ;;  %757 = vmatmul.mubr.msk.f32.gmra.mrb[6].mxu1 %vm245_vm0, %v626_v14 }
  0xa1   :  { %v119_v16 = vpop.permute.xlu1 %118  ;;  %v71_v17 = vpop.permute.xlu0 %70 }
  0xa2   :  { %vm165_vm2 = vcmp.eq.s32.totalorder %v936_v46, %v119_v16  ;;  %vm149_vm3 = vcmp.eq.s32.totalorder %v936_v46, %v71_v17 }
  0xa3   :  { %v627_v18 = vsel %vm165_vm2, 1.0, %v800_v49  ;;  %v611_v19 = vsel %vm149_vm3, 1.0, %v800_v49 }
  0xa4   :  { %735 = vmatprep.mubr.msk.f32.mxu0 %vm245_vm0, %v611_v19  ;;  %759 = vmatprep.mubr.msk.f32.mxu1 %vm245_vm0, %v627_v18 }
  0xa5   :  { %v122_v20 = vpop.permute.xlu1 %121  ;;  %v74_v21 = vpop.permute.xlu0 %73 }
  0xa6   :  { %vm166_vm4 = vcmp.eq.s32.totalorder %v936_v46, %v122_v20  ;;  %vm150_vm5 = vcmp.eq.s32.totalorder %v936_v46, %v74_v21 }
  0xa7   :  { %v628_v22 = vsel %vm166_vm4, 1.0, %v800_v49  ;;  %v612_v23 = vsel %vm150_vm5, 1.0, %v800_v49 }
  0xa8   :  { %736 = vmatmul.mubr.msk.f32.gmra.mrb[8].mxu0 %vm245_vm0, %v612_v23  ;;  %760 = vmatmul.mubr.msk.f32.gmra.mrb[8].mxu1 %vm245_vm0, %v628_v22 }
  0xa9   :  { %v125_v24 = vpop.permute.xlu1 %124  ;;  %v77_v25 = vpop.permute.xlu0 %76 }
  0xaa   :  { %vm167_vm6 = vcmp.eq.s32.totalorder %v936_v46, %v125_v24  ;;  %vm151_vm7 = vcmp.eq.s32.totalorder %v936_v46, %v77_v25 }
  0xab   :  { %v629_v26 = vsel %vm167_vm6, 1.0, %v800_v49  ;;  %v613_v27 = vsel %vm151_vm7, 1.0, %v800_v49 }
  0xac   :  { %738 = vmatprep.mubr.msk.f32.mxu0 %vm245_vm0, %v613_v27  ;;  %762 = vmatprep.mubr.msk.f32.mxu1 %vm245_vm0, %v629_v26 }
  0xad   :  { %v128_v28 = vpop.permute.xlu1 %127  ;;  %v80_v29 = vpop.permute.xlu0 %79 }
  0xae   :  { %vm168_vm8 = vcmp.eq.s32.totalorder %v936_v46, %v128_v28  ;;  %vm152_vm9 = vcmp.eq.s32.totalorder %v936_v46, %v80_v29 }
  0xaf   :  { %v630_v30 = vsel %vm168_vm8, 1.0, %v800_v49  ;;  %v614_v31 = vsel %vm152_vm9, 1.0, %v800_v49 }
  0xb0   :  { %739 = vmatmul.mubr.msk.f32.gmra.mrb[10].mxu0 %vm245_vm0, %v614_v31  ;;  %763 = vmatmul.mubr.msk.f32.gmra.mrb[10].mxu1 %vm245_vm0, %v630_v30 }
  0xb1   :  { %v131_v32 = vpop.permute.xlu1 %130  ;;  %v83_v33 = vpop.permute.xlu0 %82 }
  0xb2   :  { %vm169_vm10 = vcmp.eq.s32.totalorder %v936_v46, %v131_v32  ;;  %vm153_vm11 = vcmp.eq.s32.totalorder %v936_v46, %v83_v33 }
  0xb3   :  { %v631_v34 = vsel %vm169_vm10, 1.0, %v800_v49  ;;  %v615_v35 = vsel %vm153_vm11, 1.0, %v800_v49 }
  0xb4   :  { %741 = vmatprep.mubr.msk.f32.mxu0 %vm245_vm0, %v615_v35  ;;  %765 = vmatprep.mubr.msk.f32.mxu1 %vm245_vm0, %v631_v34 }
  0xb5   :  { %v134_v36 = vpop.permute.xlu1 %133  ;;  %v86_v37 = vpop.permute.xlu0 %85 }
  0xb6   :  { %vm170_vm12 = vcmp.eq.s32.totalorder %v936_v46, %v134_v36  ;;  %vm154_vm13 = vcmp.eq.s32.totalorder %v936_v46, %v86_v37 }
  0xb7   :  { %v632_v38 = vsel %vm170_vm12, 1.0, %v800_v49  ;;  %v616_v39 = vsel %vm154_vm13, 1.0, %v800_v49 }
  0xb8   :  { %742 = vmatmul.mubr.msk.f32.gmra.mrb[12].mxu0 %vm245_vm0, %v616_v39  ;;  %766 = vmatmul.mubr.msk.f32.gmra.mrb[12].mxu1 %vm245_vm0, %v632_v38 }
  0xb9   :  { %v137_v40 = vpop.permute.xlu1 %136  ;;  %v89_v41 = vpop.permute.xlu0 %88 }
  0xba   :  { %vm171_vm14 = vcmp.eq.s32.totalorder %v936_v46, %v137_v40  ;;  %vm155_vm15 = vcmp.eq.s32.totalorder %v936_v46, %v89_v41 }
  0xbb   :  { %v633_v42 = vsel %vm171_vm14, 1.0, %v800_v49  ;;  %v617_v43 = vsel %vm155_vm15, 1.0, %v800_v49 }
  0xbc   :  { %744 = vmatprep.mubr.msk.f32.mxu0 %vm245_vm0, %v617_v43  ;;  %768 = vmatprep.mubr.msk.f32.mxu1 %vm245_vm0, %v633_v42 }
  0xbd   :  { %v140_v44 = vpop.permute.xlu1 %139  ;;  %v92_v45 = vpop.permute.xlu0 %91 }
  0xbe   :  { %vm172_vm1 = vcmp.eq.s32.totalorder %v936_v46, %v140_v44  ;;  %vm156_vm2 = vcmp.eq.s32.totalorder %v936_v46, %v92_v45 }
  0xbf   :  { %v634_v47 = vsel %vm172_vm1, 1.0, %v800_v49  ;;  %v618_v48 = vsel %vm156_vm2, 1.0, %v800_v49 }
  0xc0   :  { %745 = vmatmul.mubr.msk.f32.gmra.mrb[14].mxu0 %vm245_vm0, %v618_v48  ;;  %769 = vmatmul.mubr.msk.f32.gmra.mrb[14].mxu1 %vm245_vm0, %v634_v47 }
 0x158   :  { %v725_v50 = vpop.f32.mrb[0].mxu0 }
 0x159   :  { %568 = vst [vmem:[%s1132_s2 + $0x8] sm:$0xff] %v725_v50  ;;  %v408_v51 = vpop.f32.mrb[1].mxu0 }
 0x15a   :  { %567 = vst [vmem:[%s1132_s2] sm:$0xff] %v408_v51 }
 0x15c   :  { %v749_v52 = vpop.f32.mrb[0].mxu1 }
 0x15d   :  { %584 = vst [vmem:[%s1132_s2 + $0x88] sm:$0xff] %v749_v52  ;;  %v488_v46 = vpop.f32.mrb[1].mxu1 }
 0x15e   :  { %583 = vst [vmem:[%s1132_s2 + $0x80] sm:$0xff] %v488_v46 }
 0x163   :  { %v728_v49 = vpop.f32.mrb[2].mxu0  ;;  %v752_v53 = vpop.f32.mrb[2].mxu1 }
 0x164   :  { %570 = vst [vmem:[%s1132_s2 + $0x18] sm:$0xff] %v728_v49  ;;  %586 = vst [vmem:[%s1132_s2 + $0x98] sm:$0xff] %v752_v53  ;;  %v418_v54 = vpop.f32.mrb[3].mxu0  ;;  %v498_v55 = vpop.f32.mrb[3].mxu1 }
 0x165   :  { %569 = vst [vmem:[%s1132_s2 + $0x10] sm:$0xff] %v418_v54  ;;  %585 = vst [vmem:[%s1132_s2 + $0x90] sm:$0xff] %v498_v55 }
 0x16b   :  { %v731_v56 = vpop.f32.mrb[4].mxu0  ;;  %v755_v57 = vpop.f32.mrb[4].mxu1 }
 0x16c   :  { %572 = vst [vmem:[%s1132_s2 + $0x28] sm:$0xff] %v731_v56  ;;  %588 = vst [vmem:[%s1132_s2 + $0xa8] sm:$0xff] %v755_v57  ;;  %v428_v58 = vpop.f32.mrb[5].mxu0  ;;  %v508_v59 = vpop.f32.mrb[5].mxu1 }
 0x16d   :  { %571 = vst [vmem:[%s1132_s2 + $0x20] sm:$0xff] %v428_v58  ;;  %587 = vst [vmem:[%s1132_s2 + $0xa0] sm:$0xff] %v508_v59 }
 0x173   :  { %v734_v60 = vpop.f32.mrb[6].mxu0  ;;  %v758_v61 = vpop.f32.mrb[6].mxu1 }
 0x174   :  { %574 = vst [vmem:[%s1132_s2 + $0x38] sm:$0xff] %v734_v60  ;;  %590 = vst [vmem:[%s1132_s2 + $0xb8] sm:$0xff] %v758_v61  ;;  %v438_v62 = vpop.f32.mrb[7].mxu0  ;;  %v518_v63 = vpop.f32.mrb[7].mxu1 }
 0x175   :  { %573 = vst [vmem:[%s1132_s2 + $0x30] sm:$0xff] %v438_v62  ;;  %589 = vst [vmem:[%s1132_s2 + $0xb0] sm:$0xff] %v518_v63 }
 0x17b   :  { %v737_v0 = vpop.f32.mrb[8].mxu0  ;;  %v761_v1 = vpop.f32.mrb[8].mxu1 }
 0x17c   :  { %576 = vst [vmem:[%s1132_s2 + $0x48] sm:$0xff] %v737_v0  ;;  %592 = vst [vmem:[%s1132_s2 + $0xc8] sm:$0xff] %v761_v1  ;;  %v448_v2 = vpop.f32.mrb[9].mxu0  ;;  %v528_v3 = vpop.f32.mrb[9].mxu1 }
 0x17d   :  { %575 = vst [vmem:[%s1132_s2 + $0x40] sm:$0xff] %v448_v2  ;;  %591 = vst [vmem:[%s1132_s2 + $0xc0] sm:$0xff] %v528_v3 }
 0x183   :  { %v740_v4 = vpop.f32.mrb[10].mxu0  ;;  %v764_v5 = vpop.f32.mrb[10].mxu1 }
 0x184   :  { %578 = vst [vmem:[%s1132_s2 + $0x58] sm:$0xff] %v740_v4  ;;  %594 = vst [vmem:[%s1132_s2 + $0xd8] sm:$0xff] %v764_v5  ;;  %v458_v6 = vpop.f32.mrb[11].mxu0  ;;  %v538_v7 = vpop.f32.mrb[11].mxu1 }
 0x185   :  { %577 = vst [vmem:[%s1132_s2 + $0x50] sm:$0xff] %v458_v6  ;;  %593 = vst [vmem:[%s1132_s2 + $0xd0] sm:$0xff] %v538_v7 }
 0x18b   :  { %v743_v8 = vpop.f32.mrb[12].mxu0  ;;  %v767_v9 = vpop.f32.mrb[12].mxu1 }
 0x18c   :  { %580 = vst [vmem:[%s1132_s2 + $0x68] sm:$0xff] %v743_v8  ;;  %596 = vst [vmem:[%s1132_s2 + $0xe8] sm:$0xff] %v767_v9  ;;  %v468_v10 = vpop.f32.mrb[13].mxu0  ;;  %v548_v11 = vpop.f32.mrb[13].mxu1 }
 0x18d   :  { %579 = vst [vmem:[%s1132_s2 + $0x60] sm:$0xff] %v468_v10  ;;  %595 = vst [vmem:[%s1132_s2 + $0xe0] sm:$0xff] %v548_v11 }
 0x193   :  { %v746_v12 = vpop.f32.mrb[14].mxu0  ;;  %v770_v13 = vpop.f32.mrb[14].mxu1 }
 0x194   :  { %582 = vst [vmem:[%s1132_s2 + $0x78] sm:$0xff] %v746_v12  ;;  %598 = vst [vmem:[%s1132_s2 + $0xf8] sm:$0xff] %v770_v13  ;;  %v478_v14 = vpop.f32.mrb[15].mxu0  ;;  %v558_v15 = vpop.f32.mrb[15].mxu1 }
 0x195   :  { %581 = vst [vmem:[%s1132_s2 + $0x70] sm:$0xff] %v478_v14  ;;  %597 = vst [vmem:[%s1132_s2 + $0xf0] sm:$0xff] %v558_v15 }

</bundles_post_ra>
